<compile_context>
chip_gen: v7x
topology: tpu7x:2x2x1
jax: 0.10.0
libtpu: 0.0.40
codegen_flags: <defaults>
</compile_context>

<pallas_src>
import jax
import jax.numpy as jnp
from jax.experimental import pallas as pl
from jax.experimental.pallas import tpu as pltpu

_LANES = 128
_SUBLANES = 8
_SMALL_BYTES = 512 * 1024  # below this, a single un-gridded VMEM block


def _query_vmem_capacity_bytes():
    """Per-core VMEM capacity; conservative v7x fallback if the query fails."""
    try:
        info = pltpu.get_tpu_info()
        cap = getattr(info, "vmem_capacity_bytes", None)
        if cap:
            return int(cap)
    except Exception:
        pass
    return 64 * 1024 * 1024


_VMEM_CAP = _query_vmem_capacity_bytes()
# Per-operand tile byte budget (3 pipelined operands x 2 buffers ~= 6x this).
_TILE_BYTES = max(1 << 20, _VMEM_CAP // 16)
_VMEM_LIMIT = int(min(_VMEM_CAP * 3 // 4, 6 * _TILE_BYTES + (16 << 20)))


def _add_pos_kernel(x_ref, pos_ref, o_ref):
    # Tiled path: x/pos/o tiles are identically shaped (tr, tc) -> pure VPU add.
    # Small path: (B, N, D) + (N, D) broadcast add, whole arrays in VMEM.
    o_ref[...] = (x_ref[...] + pos_ref[...]).astype(o_ref.dtype)


def _round_up(x, m):
    return ((x + m - 1) // m) * m


def _pick_tiles(num_rows, num_cols, itemsize, tile_bytes):
    """Pick (tr, tc) obeying the (8,128)/full-dim block constraint, the
    dtype's packed-sublane granularity, and the per-operand byte budget."""
    sub = max(_SUBLANES, 32 // itemsize)  # f32: 8, bf16: 16, int8/fp8: 32

    # Column tile: full C unless even a single `sub`-row stripe blows the
    # budget (very large D) — then tile C in multiples of 128 lanes.
    if num_cols * itemsize * sub <= tile_bytes:
        tc = num_cols
    else:
        tc = (tile_bytes // (sub * itemsize)) // _LANES * _LANES
        tc = min(max(tc, _LANES), num_cols)

    # Row tile: largest multiple of the packed sublane count under the budget.
    rows = tile_bytes // max(1, tc * itemsize)
    rows = max(sub, (rows // sub) * sub)
    tr = num_rows if rows >= num_rows else int(rows)
    return int(tr), int(tc)


def _add_pos_tiled(x3, pos2, *, tile_bytes=None):
    """x3: (B, R, C); pos2: (R, C); C lane-dense (multiple of 128 or full).
    Returns x3 + pos2[None]."""
    B, R, C = x3.shape
    itemsize = x3.dtype.itemsize
    tb = _TILE_BYTES if tile_bytes is None else int(tile_bytes)
    tr, tc = _pick_tiles(R, C, itemsize, tb)
    n_r = pl.cdiv(R, tr)
    n_c = pl.cdiv(C, tc)
    # Flat 1-D grid over (row_tile, col_tile, batch), batch innermost:
    #   - pos block index is constant for B consecutive steps -> one HBM fetch
    #     of the positional tile per (r, c) tile,
    #   - the single parallel axis has n_r*n_c*B >= B >= 2 steps, so v7x
    #     megacore sharding never collapses to a single TensorCore.
    steps = n_r * n_c * B

    def x_idx(t):
        b = t % B
        rc = t // B
        return (b, rc // n_c, rc % n_c)

    def pos_idx(t):
        rc = t // B
        return (rc // n_c, rc % n_c)

    return pl.pallas_call(
        _add_pos_kernel,
        out_shape=jax.ShapeDtypeStruct((B, R, C), x3.dtype),
        grid=(steps,),
        in_specs=[
            pl.BlockSpec((None, tr, tc), x_idx),   # batch dim squeezed
            pl.BlockSpec((tr, tc), pos_idx),
        ],
        out_specs=pl.BlockSpec((None, tr, tc), x_idx),
        compiler_params=pltpu.CompilerParams(
            dimension_semantics=("parallel",),
            vmem_limit_bytes=_VMEM_LIMIT,
        ),
    )(x3, pos2)


@jax.jit
def patch_encoder(encoded_patches: jax.Array, pos_embedding: jax.Array) -> jax.Array:
    """encoded_patches: (B, N, D); pos_embedding: (N, D) -> (B, N, D)."""
    B, N, D = encoded_patches.shape
    assert pos_embedding.shape == (N, D)
    pos = pos_embedding.astype(encoded_patches.dtype)
    itemsize = encoded_patches.dtype.itemsize

    # Small-problem fast path: whole arrays live in VMEM as one block;
    # avoids pipeline prologue + per-step overhead at toy sizes.
    if B * N * D * itemsize <= _SMALL_BYTES:
        return pl.pallas_call(
            _add_pos_kernel,
            out_shape=jax.ShapeDtypeStruct((B, N, D), encoded_patches.dtype),
        )(encoded_patches, pos)

    if D % _LANES == 0:
        # Already lane-dense: tile directly over the patch dimension.
        return _add_pos_tiled(encoded_patches, pos)

    # Lane-sparse D (e.g. D=32/96): flatten each batch element's (N, D) slab
    # to a lane-dense (rows, 128) view.  The x<->pos correspondence is
    # preserved because flattening stays within one batch element.  Pad/slice
    # (extra HBM passes) only when N*D is not already a multiple of 128.
    L = N * D
    Lp = _round_up(L, _LANES)
    pad = Lp - L
    xf = encoded_patches.reshape(B, L)
    pf = pos.reshape(L)
    if pad:
        xf = jnp.pad(xf, ((0, 0), (0, pad)))
        pf = jnp.pad(pf, (0, pad))
    R = Lp // _LANES
    out = _add_pos_tiled(xf.reshape(B, R, _LANES), pf.reshape(R, _LANES))
    out = out.reshape(B, Lp)
    if pad:
        out = out[:, :L]
    return out.reshape(B, N, D)


if __name__ == "__main__":
    keys = jax.random.split(jax.random.PRNGKey(0), 10)

    def _ref(x, p):
        return x + p[None].astype(x.dtype)

    # (a) Module-scale toy case: batch=2, num_patches=8, embed_dim=32
    #     -> small-problem single-block path.
    B, N, D = 2, 8, 32
    pos = jax.random.normal(keys[0], (N, D), dtype=jnp.float32)
    x = jax.random.normal(keys[1], (B, N, D), dtype=jnp.float32)
    out = jax.block_until_ready(patch_encoder(x, pos))
    assert out.shape == (B, N, D)
    assert jnp.allclose(out, _ref(x, pos), atol=1e-6, rtol=1e-6)

    # (b) Lane-dense tiled path (D % 128 == 0), above the small-path threshold.
    B2, N2, D2 = 2, 1024, 128
    pos2 = jax.random.normal(keys[2], (N2, D2), dtype=jnp.float32)
    x2 = jax.random.normal(keys[3], (B2, N2, D2), dtype=jnp.float32)
    out2 = jax.block_until_ready(patch_encoder(x2, pos2))
    assert jnp.allclose(out2, _ref(x2, pos2), atol=1e-6, rtol=1e-6)

    # (c) Lane-sparse path with padding (N*D % 128 != 0) and a full-R block
    #     whose row count is not a multiple of 8.
    B3, N3, D3 = 2, 1030, 96
    pos3 = jax.random.normal(keys[4], (N3, D3), dtype=jnp.float32)
    x3 = jax.random.normal(keys[5], (B3, N3, D3), dtype=jnp.float32)
    out3 = jax.block_until_ready(patch_encoder(x3, pos3))
    assert jnp.allclose(out3, _ref(x3, pos3), atol=1e-6, rtol=1e-6)

    # (d) Lane-sparse, pad-free path in bf16 (exercises 16-row packed-sublane
    #     tiling; N*D is already a multiple of 128 so no pad/slice passes).
    B4, N4, D4 = 2, 2048, 96
    pos4 = jax.random.normal(keys[6], (N4, D4), dtype=jnp.bfloat16)
    x4 = jax.random.normal(keys[7], (B4, N4, D4), dtype=jnp.bfloat16)
    out4 = jax.block_until_ready(patch_encoder(x4, pos4))
    assert jnp.allclose(out4.astype(jnp.float32), _ref(x4, pos4).astype(jnp.float32))

    # (e) Direct tiled call with a tiny tile budget to lock in correctness of
    #     Pallas partial-last-block masking (R=100 not divisible by tr=8).
    B5, R5, C5 = 2, 100, 128
    p5 = jax.random.normal(keys[8], (R5, C5), dtype=jnp.float32)
    x5 = jax.random.normal(keys[9], (B5, R5, C5), dtype=jnp.float32)
    out5 = jax.block_until_ready(_add_pos_tiled(x5, p5, tile_bytes=8 * 128 * 4))
    assert jnp.allclose(out5, x5 + p5[None], atol=1e-6, rtol=1e-6)

    print("KERNEL_OK")
</pallas_src>

<mosaic_0001>
module attributes {stable_mosaic.version = 11 : i64} {
  func.func @_add_pos_kernel(%arg0: memref<2x8x32xf32, #tpu.memory_space<vmem>>, %arg1: memref<8x32xf32, #tpu.memory_space<vmem>>, %arg2: memref<2x8x32xf32, #tpu.memory_space<vmem>>) attributes {dimension_semantics = [], scalar_prefetch = 0 : i64, scratch_operands = 0 : i64, tpu.core_type = #tpu.core_type<tc>} {
    %c0 = arith.constant 0 : index
    %c0_0 = arith.constant 0 : index
    %c0_1 = arith.constant 0 : index
    %0 = vector.load %arg0[%c0, %c0_0, %c0_1] : memref<2x8x32xf32, #tpu.memory_space<vmem>>, vector<2x8x32xf32>
    %c0_2 = arith.constant 0 : index
    %c0_3 = arith.constant 0 : index
    %1 = vector.load %arg1[%c0_2, %c0_3] : memref<8x32xf32, #tpu.memory_space<vmem>>, vector<8x32xf32>
    %2 = vector.shape_cast %1 : vector<8x32xf32> to vector<1x8x32xf32>
    %3 = vector.broadcast %2 : vector<1x8x32xf32> to vector<2x8x32xf32>
    %4 = arith.addf %0, %3 : vector<2x8x32xf32>
    %c0_4 = arith.constant 0 : index
    %c0_5 = arith.constant 0 : index
    %c0_6 = arith.constant 0 : index
    %5 = vector.load %arg2[%c0_4, %c0_5, %c0_6] : memref<2x8x32xf32, #tpu.memory_space<vmem>>, vector<2x8x32xf32>
    tpu.vector_store %arg2[%c0_4, %c0_5, %c0_6], %4 {strides = array<i32>} : memref<2x8x32xf32, #tpu.memory_space<vmem>>, vector<2x8x32xf32>,
    return
  }
}

</mosaic_0001>

<bundles_post_ra>
// kernel: patch_encoder.1
= control target key start
LH: loop header
LB: loop body
LE: loop exit
PB: predicated region body
PF: predicated region fallthrough
CT: control target
= control target key end

     0   :  { %7 = vsyncpa [#allocation3], 0  ;;  %s203_s0 = inlined_call_operand.hbm [shape: f32[2,8,32], index: 0, kind: input, shape index: {}]   ;;  %s204_s1 = inlined_call_operand.hbm [shape: f32[8,32], index: 1, kind: input, shape index: {}]   ;;  %s205_s2 = inlined_call_operand.hbm [shape: f32[2,8,32], index: 2, kind: output, shape index: {}]  }
   0x1   :  { %8 = vsyncpa [#allocation6], 0 }
   0x2   :  { %9 = vsyncpa [#allocation4], 0  ;;  %s141_s9 = smov [#allocation2]   ;;  %s69_s13 = scalar_lea.hbm %s203_s0, 256 }
   0x3   :  { %s15_s10 = sshll.u32 %s141_s9, 4  ;;  %p70_p0 = scmp.ne.s32.totalorder %s203_s0, %s69_s13  ;;  %s16_s10 = int_to_ptr.vmem [resolvable:$true] %s15_s10 }
   0x4   :  { %p73_p1 = scmp.lt.u32.totalorder %s69_s13, %s203_s0 }
   0x6   :  { %p75_p2 = pnand %p73_p1, %p70_p0 }
   0x8   :  { %78 = shalt.err (!%p75_p2)
}
   0x9   :  { %s79_s18 = scalar_lea.vmem %s16_s10, 256  ;;  %p84_p4 = scmp.lt.s32.totalorder %s16_s10, %s16_s10 }
   0xa   :  { %p80_p3 = scmp.ne.s32.totalorder %s16_s10, %s79_s18  ;;  %p85_p5 = scmp.lt.s32.totalorder %s79_s18, %s79_s18 }
   0xc   :  { %p86_p6 = por %p85_p5, %p84_p4 }
   0xe   :  { %p87_p7 = pnand %p86_p6, %p80_p3 }
  0x10   :  { %90 = shalt.err (!%p87_p7)
}
  0x11   :  { %s142_s19 = smov 128   ;;  %s143_s20 = smov 8  }
  0x12   :  { %21 = dma.hbm_to_vmem [thread:$0]  %s203_s0, 256, %s16_s10, [#allocation3], %s142_s19, %s142_s19, %s143_s20  }
  0x13   :  { %s144_s23 = smov [#allocation5]   ;;  %s91_s27 = scalar_lea.hbm %s204_s1, 128 }
  0x14   :  { %s28_s24 = sshll.u32 %s144_s23, 4  ;;  %p92_p8 = scmp.ne.s32.totalorder %s204_s1, %s91_s27  ;;  %s29_s24 = int_to_ptr.vmem [resolvable:$true] %s28_s24 }
  0x15   :  { %p95_p9 = scmp.lt.u32.totalorder %s91_s27, %s204_s1 }
  0x17   :  { %p97_p10 = pnand %p95_p9, %p92_p8 }
  0x19   :  { %100 = shalt.err (!%p97_p10)
}
  0x1a   :  { %s101_s4 = scalar_lea.vmem %s29_s24, 128  ;;  %p106_p12 = scmp.lt.s32.totalorder %s29_s24, %s29_s24 }
  0x1b   :  { %p102_p11 = scmp.ne.s32.totalorder %s29_s24, %s101_s4  ;;  %p107_p13 = scmp.lt.s32.totalorder %s101_s4, %s101_s4 }
  0x1d   :  { %p108_p0 = por %p107_p13, %p106_p12 }
  0x1f   :  { %p109_p1 = pnand %p108_p0, %p102_p11 }
  0x21   :  { %112 = shalt.err (!%p109_p1)
}
  0x22   :  { %31 = dma.hbm_to_vmem [thread:$0]  %s204_s1, 128, %s29_s24, [#allocation6]  }
  0x23   :  { %135 = dma.done.wait [#allocation3], 256  }
  0x24   :  { %136 = vsyncadd [#allocation3], 4294967040 }
  0x25   :  { %137 = dma.done.wait [#allocation6], 128  }
  0x26   :  { %138 = vsyncadd [#allocation6], 4294967168  ;;  %s145_s6 = smov [#allocation7]   ;;  %v38_v0 = vld [vmem:[#allocation2] sm:$0xff]  ;;  %v40_v1 = vld [vmem:[#allocation5] sm:$0xff]  ;;  %vm43_vm0 = vcmask 261120  }
  0x27   :  { %s51_s7 = sshll.u32 %s145_s6, 4  ;;  %v39_v2 = vld [vmem:[#allocation2 + $0x8] sm:$0xff]  ;;  %v41_v3 = vadd.f32 %v40_v1, %v38_v0  ;;  %s52_s7 = int_to_ptr.vmem [resolvable:$true] %s51_s7 }
  0x28   :  { %v42_v4 = vadd.f32 %v40_v1, %v39_v2  ;;  %s113_s8 = scalar_lea.vmem %s52_s7, 256  ;;  %p118_p3 = scmp.lt.s32.totalorder %s52_s7, %s52_s7 }
  0x29   :  { %44 = vst.msk [vmem:[#allocation7] sm:$0xff] %vm43_vm0, %v41_v3  ;;  %p114_p2 = scmp.ne.s32.totalorder %s52_s7, %s113_s8  ;;  %p119_p4 = scmp.lt.s32.totalorder %s113_s8, %s113_s8 }
  0x2a   :  { %45 = vst.msk [vmem:[#allocation7 + $0x8] sm:$0xff] %vm43_vm0, %v42_v4 }
  0x2b   :  { %p120_p5 = por %p119_p4, %p118_p3 }
  0x2d   :  { %p121_p6 = pnand %p120_p5, %p114_p2 }
  0x2f   :  { %124 = shalt.err (!%p121_p6)
}
  0x30   :  { %s125_s10 = scalar_lea.hbm %s205_s2, 256 }
  0x31   :  { %p126_p7 = scmp.ne.s32.totalorder %s205_s2, %s125_s10  ;;  %p129_p8 = scmp.lt.u32.totalorder %s125_s10, %s205_s2 }
  0x33   :  { %p131_p9 = pnand %p129_p8, %p126_p7 }
  0x35   :  { %134 = shalt.err (!%p131_p9)
}
  0x36   :  { %57 = dma.vmem_to_hbm [thread:$0]  %s52_s7, 256, %s205_s2, [#allocation4], %s142_s19, %s142_s19, %s143_s20  }
  0x37   :  { %139 = dma.done.wait [#allocation4], 256  }
  0x38   :  { %140 = vsyncadd [#allocation4], 4294967040 }
  0x39   :  { %61 = vsyncpa [#allocation3], 1 }
  0x3a   :  { %62 = vsyncpa [#allocation6], 1 }
  0x3b   :  { %63 = vsyncpa [#allocation4], 1 }

</bundles_post_ra>
